<compile_context>
chip_gen: v7x
topology: tpu7x:2x2x1
jax: 0.10.0
libtpu: 0.0.40
codegen_flags: <defaults>
</compile_context>

<pallas_src>
import jax
import jax.numpy as jnp
from jax.experimental import pallas as pl
from jax.experimental.pallas import tpu as pltpu


# -----------------------------------------------------------------------------
# Kernel (transposed layout: batch on lanes, experts / hidden on sublanes)
#   x_ref  : (E, TB)      streamed input tile
#   p_ref  : (32, E+51)   packed params (torch convention: W is (out, in))
#   out_ref: (E+1, TB)    rows [0:E] = softmax weights, row E = final prediction
# -----------------------------------------------------------------------------
def gating_kernel(x_ref, p_ref, out_ref):
    E, TB = x_ref.shape
    x = x_ref[...]                                           # (E, TB) f32

    # Static slices of the packed parameter block (VMEM-resident, single DMA).
    w1 = p_ref[0:32, 0:E]                                    # (32, E)
    b1 = p_ref[0:32, E:E + 1]                                # (32, 1)
    w2 = p_ref[0:16, E + 1:E + 33]                           # (16, 32)
    b2 = p_ref[0:16, E + 33:E + 34]                          # (16, 1)
    w3 = p_ref[0:E, E + 34:E + 50]                           # (E, 16)
    b3 = p_ref[0:E, E + 50:E + 51]                           # (E, 1)

    # Linear(E, 32) + ReLU.  K = E (tiny): unrolled VPU broadcast-FMA, no MXU trip.
    acc1 = jnp.zeros((32, TB), jnp.float32)
    for e in range(E):                                       # static unroll (E small)
        acc1 = acc1 + w1[:, e:e + 1] * x[e:e + 1, :]
    h1 = jnp.maximum(acc1 + b1, 0.0)                         # (32, TB)

    # Linear(32, 16) + ReLU on the MXU (lane-dense N = TB output).
    h2 = jnp.maximum(
        jnp.dot(w2, h1, preferred_element_type=jnp.float32) + b2, 0.0)   # (16, TB)

    # Linear(16, E).
    logits = jnp.dot(w3, h2, preferred_element_type=jnp.float32) + b3    # (E, TB)

    # Softmax over the expert axis (sublane axis, E rows).
    m = jnp.max(logits, axis=0, keepdims=True)               # (1, TB)
    ex = jnp.exp(logits - m)
    denom = jnp.sum(ex, axis=0, keepdims=True)
    weights = ex * pl.reciprocal(denom, approx=True)         # (E, TB)

    # Weighted combination of expert predictions.
    pred = jnp.sum(x * weights, axis=0, keepdims=True)       # (1, TB)

    out_ref[0:E, :] = weights.astype(out_ref.dtype)
    out_ref[E:E + 1, :] = pred.astype(out_ref.dtype)


# -----------------------------------------------------------------------------
# Wrapper: layout plumbing (transpose / pad / pack) lives here, not in-kernel.
# -----------------------------------------------------------------------------
def gating_network_forward(x, params, *, tb_target=512):
    """x: (batch, num_experts).  Returns (final_prediction (B,1), weights (B,E))."""
    w1, b1, w2, b2, w3, b3 = params                          # torch (out, in) convention
    B, E = x.shape

    # Pack all parameters into one lane-contiguous f32 slab (single DMA).
    p_cols = E + 51
    p = jnp.zeros((32, p_cols), jnp.float32)
    p = p.at[0:32, 0:E].set(w1.astype(jnp.float32))
    p = p.at[0:32, E:E + 1].set(b1.astype(jnp.float32).reshape(32, 1))
    p = p.at[0:16, E + 1:E + 33].set(w2.astype(jnp.float32))
    p = p.at[0:16, E + 33:E + 34].set(b2.astype(jnp.float32).reshape(16, 1))
    p = p.at[0:E, E + 34:E + 50].set(w3.astype(jnp.float32))
    p = p.at[0:E, E + 50:E + 51].set(b3.astype(jnp.float32).reshape(E, 1))

    # Batch on the lane axis; tile + pad the batch to a multiple of the tile.
    if B <= tb_target:
        tb, b_pad = B, B                 # single tile; full-dim block is legal
    else:
        tb = tb_target                   # multiple of 128 -> lane-dense blocks
        b_pad = -(-B // tb) * tb

    xt = x.astype(jnp.float32).T                             # (E, B)
    if b_pad != B:
        xt = jnp.pad(xt, ((0, 0), (0, b_pad - B)))

    out = pl.pallas_call(
        gating_kernel,
        out_shape=jax.ShapeDtypeStruct((E + 1, b_pad), jnp.float32),
        grid=(b_pad // tb,),
        in_specs=[
            pl.BlockSpec((E, tb), lambda i: (0, i)),          # streamed x tile
            pl.BlockSpec((32, p_cols), lambda i: (0, 0)),     # params, fetched once
        ],
        out_specs=pl.BlockSpec((E + 1, tb), lambda i: (0, i)),
        compiler_params=pltpu.CompilerParams(
            dimension_semantics=("parallel",)),               # v7x: shard across TCs
    )(xt, p)

    expert_weights = out[0:E, 0:B].T.astype(x.dtype)          # (B, E)
    final_prediction = out[E:E + 1, 0:B].T.astype(x.dtype)    # (B, 1)
    return final_prediction, expert_weights


# -----------------------------------------------------------------------------
# Parameter init mirroring nn.Linear defaults + _initialize_uniform_weights
# (weights stored in torch (out_features, in_features) convention).
# -----------------------------------------------------------------------------
def init_params(key, input_size=3):
    def linear_init(k, fan_in, fan_out):
        kw, kb = jax.random.split(k)
        bound = 1.0 / float(fan_in) ** 0.5
        w = jax.random.uniform(kw, (fan_out, fan_in), jnp.float32, -bound, bound)
        b = jax.random.uniform(kb, (fan_out,), jnp.float32, -bound, bound)
        return w, b

    k1, k2, _ = jax.random.split(key, 3)
    w1, b1 = linear_init(k1, input_size, 32)
    w2, b2 = linear_init(k2, 32, 16)
    # Final layer zero-init (per _initialize_uniform_weights) -> uniform softmax.
    w3 = jnp.zeros((input_size, 16), jnp.float32)
    b3 = jnp.zeros((input_size,), jnp.float32)
    return (w1, b1, w2, b2, w3, b3)


# Pure-JAX reference (matches the PyTorch forward).
def reference_forward(x, params):
    w1, b1, w2, b2, w3, b3 = params
    h1 = jnp.maximum(x @ w1.T + b1, 0.0)
    h2 = jnp.maximum(h1 @ w2.T + b2, 0.0)
    logits = h2 @ w3.T + b3
    weights = jax.nn.softmax(logits, axis=1)
    pred = jnp.sum(x * weights, axis=1, keepdims=True)
    return pred, weights


if __name__ == "__main__":
    key = jax.random.PRNGKey(0)
    kx1, kx2, kp, kr = jax.random.split(key, 4)

    num_experts = 3
    params = init_params(kp, input_size=num_experts)

    # Second param set with a non-zero final layer so the softmax is non-trivial.
    w3r = 0.25 * jax.random.normal(kr, (num_experts, 16), jnp.float32)
    b3r = 0.1 * jax.random.normal(jax.random.fold_in(kr, 1), (num_experts,), jnp.float32)
    params_rand = params[:4] + (w3r, b3r)

    cases = [
        # Small batch, module-default init (single tile path).
        (jax.random.normal(kx1, (8, num_experts), jnp.float32), params),
        # Larger batch to exercise the tiled / pipelined grid path (2 tiles of 512).
        (jax.random.normal(kx2, (1024, num_experts), jnp.float32), params_rand),
    ]

    for x, prm in cases:
        pred, wts = gating_network_forward(x, prm)
        jax.block_until_ready((pred, wts))
        ref_pred, ref_wts = reference_forward(x, prm)
        assert pred.shape == (x.shape[0], 1)
        assert wts.shape == x.shape
        # Tolerance covers EUP approx-reciprocal and MXU pass precision.
        assert jnp.allclose(pred, ref_pred, atol=1e-2, rtol=1e-2), \
            float(jnp.max(jnp.abs(pred - ref_pred)))
        assert jnp.allclose(wts, ref_wts, atol=1e-2, rtol=1e-2), \
            float(jnp.max(jnp.abs(wts - ref_wts)))

    print("KERNEL_OK")
</pallas_src>

<mosaic_0001>
module attributes {stable_mosaic.version = 11 : i64} {
  func.func @gating_kernel(%arg0: i32, %arg1: memref<3x8xf32, #tpu.memory_space<vmem>>, %arg2: memref<32x54xf32, #tpu.memory_space<vmem>>, %arg3: memref<4x8xf32, #tpu.memory_space<vmem>>) attributes {dimension_semantics = [#tpu.dimension_semantics<parallel>], iteration_bounds = array<i64: 1>, scalar_prefetch = 0 : i64, scratch_operands = 0 : i64, tpu.core_type = #tpu.core_type<tc>, window_params = [{transform_indices = @transform_0, window_bounds = array<i64: 3, 8>}, {pipeline_mode = #tpu.pipeline_mode<synchronous>, transform_indices = @transform_1, window_bounds = array<i64: 32, 54>}, {transform_indices = @transform_2, window_bounds = array<i64: 4, 8>}]} {
    %c0 = arith.constant 0 : index
    %c0_0 = arith.constant 0 : index
    %0 = vector.load %arg1[%c0, %c0_0] : memref<3x8xf32, #tpu.memory_space<vmem>>, vector<3x8xf32>
    %c0_1 = arith.constant 0 : index
    %c0_2 = arith.constant 0 : index
    %1 = vector.load %arg2[%c0_1, %c0_2] : memref<32x54xf32, #tpu.memory_space<vmem>>, vector<32x3xf32>
    %c0_3 = arith.constant 0 : index
    %c3 = arith.constant 3 : index
    %2 = vector.load %arg2[%c0_3, %c3] : memref<32x54xf32, #tpu.memory_space<vmem>>, vector<32x1xf32>
    %c0_4 = arith.constant 0 : index
    %c4 = arith.constant 4 : index
    %3 = vector.load %arg2[%c0_4, %c4] : memref<32x54xf32, #tpu.memory_space<vmem>>, vector<16x32xf32>
    %c0_5 = arith.constant 0 : index
    %c36 = arith.constant 36 : index
    %4 = vector.load %arg2[%c0_5, %c36] : memref<32x54xf32, #tpu.memory_space<vmem>>, vector<16x1xf32>
    %c0_6 = arith.constant 0 : index
    %c37 = arith.constant 37 : index
    %5 = vector.load %arg2[%c0_6, %c37] : memref<32x54xf32, #tpu.memory_space<vmem>>, vector<3x16xf32>
    %c0_7 = arith.constant 0 : index
    %c53 = arith.constant 53 : index
    %6 = vector.load %arg2[%c0_7, %c53] : memref<32x54xf32, #tpu.memory_space<vmem>>, vector<3x1xf32>
    %cst = arith.constant 0.000000e+00 : f32
    %7 = vector.broadcast %cst : f32 to vector<32x8xf32>
    %8 = vector.extract_strided_slice %1 {offsets = [0, 0], sizes = [32, 1], strides = [1, 1]} : vector<32x3xf32> to vector<32x1xf32>
    %9 = vector.extract_strided_slice %0 {offsets = [0, 0], sizes = [1, 8], strides = [1, 1]} : vector<3x8xf32> to vector<1x8xf32>
    %10 = vector.broadcast %8 : vector<32x1xf32> to vector<32x8xf32>
    %11 = vector.broadcast %9 : vector<1x8xf32> to vector<32x8xf32>
    %12 = arith.mulf %10, %11 : vector<32x8xf32>
    %13 = arith.addf %7, %12 : vector<32x8xf32>
    %14 = vector.extract_strided_slice %1 {offsets = [0, 1], sizes = [32, 1], strides = [1, 1]} : vector<32x3xf32> to vector<32x1xf32>
    %15 = vector.extract_strided_slice %0 {offsets = [1, 0], sizes = [1, 8], strides = [1, 1]} : vector<3x8xf32> to vector<1x8xf32>
    %16 = vector.broadcast %14 : vector<32x1xf32> to vector<32x8xf32>
    %17 = vector.broadcast %15 : vector<1x8xf32> to vector<32x8xf32>
    %18 = arith.mulf %16, %17 : vector<32x8xf32>
    %19 = arith.addf %13, %18 : vector<32x8xf32>
    %20 = vector.extract_strided_slice %1 {offsets = [0, 2], sizes = [32, 1], strides = [1, 1]} : vector<32x3xf32> to vector<32x1xf32>
    %21 = vector.extract_strided_slice %0 {offsets = [2, 0], sizes = [1, 8], strides = [1, 1]} : vector<3x8xf32> to vector<1x8xf32>
    %22 = vector.broadcast %20 : vector<32x1xf32> to vector<32x8xf32>
    %23 = vector.broadcast %21 : vector<1x8xf32> to vector<32x8xf32>
    %24 = arith.mulf %22, %23 : vector<32x8xf32>
    %25 = arith.addf %19, %24 : vector<32x8xf32>
    %26 = vector.broadcast %2 : vector<32x1xf32> to vector<32x8xf32>
    %27 = arith.addf %25, %26 : vector<32x8xf32>
    %cst_8 = arith.constant 0.000000e+00 : f32
    %28 = vector.broadcast %cst_8 : f32 to vector<32x8xf32>
    %29 = arith.maximumf %27, %28 : vector<32x8xf32>
    %cst_9 = arith.constant dense<0.000000e+00> : vector<16x8xf32>
    %30 = tpu.matmul %3, %29, %cst_9 {dimension_numbers = #tpu.dot_dimension_numbers<[1], [0], [0], [1], [0, 0, 1, 1], [], []>} : vector<16x32xf32>, vector<32x8xf32>, vector<16x8xf32> -> vector<16x8xf32>
    %31 = vector.broadcast %4 : vector<16x1xf32> to vector<16x8xf32>
    %32 = arith.addf %30, %31 : vector<16x8xf32>
    %cst_10 = arith.constant 0.000000e+00 : f32
    %33 = vector.broadcast %cst_10 : f32 to vector<16x8xf32>
    %34 = arith.maximumf %32, %33 : vector<16x8xf32>
    %cst_11 = arith.constant dense<0.000000e+00> : vector<3x8xf32>
    %35 = tpu.matmul %5, %34, %cst_11 {dimension_numbers = #tpu.dot_dimension_numbers<[1], [0], [0], [1], [0, 0, 1, 1], [], []>} : vector<3x16xf32>, vector<16x8xf32>, vector<3x8xf32> -> vector<3x8xf32>
    %36 = vector.broadcast %6 : vector<3x1xf32> to vector<3x8xf32>
    %37 = arith.addf %35, %36 : vector<3x8xf32>
    %cst_12 = arith.constant dense<0xFF800000> : vector<8xf32>
    %38 = vector.multi_reduction <maximumf>, %37, %cst_12 [0] : vector<3x8xf32> to vector<8xf32>
    %39 = vector.shape_cast %38 : vector<8xf32> to vector<1x8xf32>
    %40 = vector.broadcast %39 : vector<1x8xf32> to vector<3x8xf32>
    %41 = arith.subf %37, %40 : vector<3x8xf32>
    %42 = math.exp %41 : vector<3x8xf32>
    %cst_13 = arith.constant dense<0.000000e+00> : vector<8xf32>
    %43 = vector.multi_reduction <add>, %42, %cst_13 [0] : vector<3x8xf32> to vector<8xf32>
    %44 = vector.shape_cast %43 : vector<8xf32> to vector<1x8xf32>
    %45 = tpu.reciprocal %44 {approx = true} : vector<1x8xf32> -> vector<1x8xf32>
    %46 = vector.broadcast %45 : vector<1x8xf32> to vector<3x8xf32>
    %47 = arith.mulf %42, %46 : vector<3x8xf32>
    %48 = arith.mulf %0, %47 : vector<3x8xf32>
    %cst_14 = arith.constant dense<0.000000e+00> : vector<8xf32>
    %49 = vector.multi_reduction <add>, %48, %cst_14 [0] : vector<3x8xf32> to vector<8xf32>
    %50 = vector.shape_cast %49 : vector<8xf32> to vector<1x8xf32>
    %c0_15 = arith.constant 0 : index
    %c0_16 = arith.constant 0 : index
    %51 = vector.load %arg3[%c0_15, %c0_16] : memref<4x8xf32, #tpu.memory_space<vmem>>, vector<3x8xf32>
    tpu.vector_store %arg3[%c0_15, %c0_16], %47 {strides = array<i32>} : memref<4x8xf32, #tpu.memory_space<vmem>>, vector<3x8xf32>,
    %c3_17 = arith.constant 3 : index
    %c0_18 = arith.constant 0 : index
    %52 = vector.load %arg3[%c3_17, %c0_18] : memref<4x8xf32, #tpu.memory_space<vmem>>, vector<1x8xf32>
    tpu.vector_store %arg3[%c3_17, %c0_18], %50 {strides = array<i32>} : memref<4x8xf32, #tpu.memory_space<vmem>>, vector<1x8xf32>,
    return
  }
  func.func @transform_0(%arg0: i32) -> (i32, i32) {
    %c0_i32 = arith.constant 0 : i32
    %c0_i32_0 = arith.constant 0 : i32
    return %c0_i32, %arg0 : i32, i32
  }
  func.func @transform_1(%arg0: i32) -> (i32, i32) {
    %c0_i32 = arith.constant 0 : i32
    %c0_i32_0 = arith.constant 0 : i32
    %c0_i32_1 = arith.constant 0 : i32
    return %c0_i32, %c0_i32_0 : i32, i32
  }
  func.func @transform_2(%arg0: i32) -> (i32, i32) {
    %c0_i32 = arith.constant 0 : i32
    %c0_i32_0 = arith.constant 0 : i32
    return %c0_i32, %arg0 : i32, i32
  }
}

</mosaic_0001>

<bundles_post_ra>
// kernel: tpu_custom_call.1
= control target key start
LH: loop header
LB: loop body
LE: loop exit
PB: predicated region body
PF: predicated region fallthrough
CT: control target
= control target key end

     0   :  { %7 = vsyncpa [#allocation3], 0  ;;  %s612_s0 = inlined_call_operand.hbm [shape: f32[3,8], index: 0, kind: input, shape index: {}]   ;;  %s613_s1 = inlined_call_operand.hbm [shape: f32[32,54], index: 1, kind: input, shape index: {}]   ;;  %s614_s2 = inlined_call_operand.hbm [shape: f32[4,8], index: 2, kind: output, shape index: {}]  }
   0x1   :  { %8 = vsyncpa [#allocation6], 0 }
   0x2   :  { %9 = vsyncpa [#allocation4], 0  ;;  %s522_s9 = smov [#allocation2]   ;;  %s523_s11 = smov [#allocation5]  }
   0x3   :  { %s16_s10 = sshll.u32 %s522_s9, 4  ;;  %s25_s12 = sshll.u32 %s523_s11, 4  ;;  %s17_s10 = int_to_ptr.vmem [resolvable:$true] %s16_s10  ;;  %s553_s12 = int_to_ptr.vmem [resolvable:$true] %s25_s12 }
   0x4   :  { %s450_s15 = scalar_lea.hbm %s612_s0, 64 }
   0x5   :  { %p451_p0 = scmp.ne.s32.totalorder %s612_s0, %s450_s15  ;;  %p454_p1 = scmp.lt.u32.totalorder %s450_s15, %s612_s0 }
   0x7   :  { %p456_p2 = pnand %p454_p1, %p451_p0 }
   0x9   :  { %459 = shalt.err (!%p456_p2)
}
   0xa   :  { %s460_s20 = scalar_lea.vmem %s17_s10, 64  ;;  %p465_p4 = scmp.lt.s32.totalorder %s17_s10, %s17_s10 }
   0xb   :  { %p461_p3 = scmp.ne.s32.totalorder %s17_s10, %s460_s20  ;;  %p466_p5 = scmp.lt.s32.totalorder %s460_s20, %s460_s20 }
   0xd   :  { %p467_p6 = por %p466_p5, %p465_p4 }
   0xf   :  { %p468_p7 = pnand %p467_p6, %p461_p3 }
  0x11   :  { %471 = shalt.err (!%p468_p7)
}
  0x12   :  { %19 = dma.hbm_to_vmem [thread:$0]  %s612_s0, 64, %s17_s10, [#allocation3]  }
  0x13   :  { %s472_s25 = scalar_lea.hbm %s613_s1, 512 }
  0x14   :  { %p473_p8 = scmp.ne.s32.totalorder %s613_s1, %s472_s25  ;;  %p476_p9 = scmp.lt.u32.totalorder %s472_s25, %s613_s1 }
  0x16   :  { %p478_p10 = pnand %p476_p9, %p473_p8 }
  0x18   :  { %481 = shalt.err (!%p478_p10)
}
  0x19   :  { %s482_s30 = scalar_lea.vmem %s553_s12, 512  ;;  %p487_p12 = scmp.lt.s32.totalorder %s553_s12, %s553_s12 }
  0x1a   :  { %p483_p11 = scmp.ne.s32.totalorder %s553_s12, %s482_s30  ;;  %p488_p13 = scmp.lt.s32.totalorder %s482_s30, %s482_s30 }
  0x1c   :  { %p489_p0 = por %p488_p13, %p487_p12 }
  0x1e   :  { %p490_p1 = pnand %p489_p0, %p483_p11 }
  0x20   :  { %493 = shalt.err (!%p490_p1)
}
  0x21   :  { %s524_s0 = smov 128   ;;  %s525_s3 = smov 8  }
  0x22   :  { %31 = dma.hbm_to_vmem [thread:$0]  %s613_s1, 512, %s553_s12, [#allocation6], %s524_s0, %s524_s0, %s525_s3  }
  0x23   :  { %516 = dma.done.wait [#allocation3], 64  }
  0x24   :  { %517 = vsyncadd [#allocation3], 4294967232 }
  0x25   :  { %518 = dma.done.wait [#allocation6], 512  }
  0x26   :  { %519 = vsyncadd [#allocation6], 4294966784  ;;  %v526_v0 = vmov 1   ;;  %v527_v1 = vmov 0   ;;  %v39_v2 = vld [vmem:[#allocation5] sm:$0xff]  ;;  %v40_v3 = vld [vmem:[#allocation5 + $0x8] sm:$0xff]  ;;  %v64_v16 = vlaneseq }
  0x27   :  { %435 = vset.pattern.permute.xlu1 %v526_v0  ;;  %434 = vset.pattern.permute.xlu0 %v527_v1  ;;  %v42_v4 = vld [vmem:[#allocation5 + $0x18] sm:$0xff]  ;;  %v528_v5 = vmov 2   ;;  %v41_v6 = vld [vmem:[#allocation5 + $0x10] sm:$0xff]  ;;  %v529_v7 = vmov 3   ;;  %s530_s1 = smov 124   ;;  %v531_v8 = vmov 36  }
  0x28   :  { %77 = vperm.xlu1 %435, %v39_v2   ;;  %46 = vperm.xlu0 %434, %v39_v2   ;;  %v584_v9 = vld [vmem:[#allocation5] sm:$0x7]  ;;  %s532_s6 = smov 91   ;;  %v65_v18 = vshrl.u32 %v64_v16, 7  ;;  %v587_v24 = vld [vmem:[#allocation2] sm:$0x7] }
  0x29   :  { %vm168_vm0 = vcmask 261120   ;;  %vm534_vm1 = vmmov 0   ;;  %vm257_vm2 = vcmask 130048   ;;  %vm330_vm3 = vcmask 59392   ;;  %s537_s7 = smov [#allocation7]  }
  0x2a   :  { %v94_v21 = vsub.s32 1, %v65_v18  ;;  %v66_v22 = vsub.s32 0, %v65_v18  ;;  %v122_v23 = vsub.s32 2, %v65_v18  ;;  %s367_s8 = sshll.u32 %s537_s7, 4  ;;  %vm359_vm4 = vcmask 57344   ;;  %s368_s8 = int_to_ptr.vmem [resolvable:$true] %s367_s8 }
  0x2b   :  { %s494_s9 = scalar_lea.vmem %s368_s8, 64  ;;  %p499_p3 = scmp.lt.s32.totalorder %s368_s8, %s368_s8 }
  0x2c   :  { %81 = vperm.xlu1 %435, %v40_v3   ;;  %51 = vperm.xlu0 %434, %v40_v3   ;;  %v95_v26 = vrot.slane %v587_v24, %v94_v21  ;;  %v67_v27 = vrot.slane %v587_v24, %v66_v22  ;;  %v123_v28 = vrot.slane %v587_v24, %v122_v23  ;;  %p495_p2 = scmp.ne.s32.totalorder %s368_s8, %s494_s9  ;;  %p500_p4 = scmp.lt.s32.totalorder %s494_s9, %s494_s9 }
  0x2e   :  { %p501_p5 = por %p500_p4, %p499_p3 }
  0x30   :  { %436 = vset.pattern.permute.xlu1 %v528_v5  ;;  %61 = vperm.xlu0 %434, %v42_v4   ;;  %p502_p6 = pnand %p501_p5, %p495_p2 }
  0x31   :  { %109 = vperm.xlu1 %436, %v40_v3  }
  0x34   :  { %438 = vset.pattern.permute.xlu0 %v528_v5 }
  0x35   :  { %437 = vset.pattern.permute.xlu1 %v527_v1  ;;  %105 = vperm.xlu0 %438, %v39_v2  }
  0x36   :  { %56 = vperm.xlu1 %437, %v41_v6  }
  0x39   :  { %113 = vperm.xlu0 %438, %v41_v6  }
  0x3a   :  { %439 = vset.pattern.permute.xlu1 %v526_v0 }
  0x3b   :  { %85 = vperm.xlu1 %439, %v41_v6  }
  0x3d   :  { %442 = vset.pattern.permute.xlu0 %v529_v7 }
  0x3e   :  { %137 = vperm.xlu0 %442, %v40_v3  }
  0x3f   :  { %89 = vperm.xlu1 %439, %v42_v4  }
  0x42   :  { %164 = vrot.lane.b32.xlu0 %v39_v2, %s530_s1 }
  0x43   :  { %440 = vset.pattern.permute.xlu1 %v528_v5  ;;  %443 = vset.pattern.permute.xlu0 %v531_v8  ;;  %v536_v5 = vmov 53  }
  0x44   :  { %117 = vperm.xlu1 %440, %v42_v4  }
  0x46   :  { %157 = vperm.xlu0 %443, %v39_v2  }
  0x48   :  { %441 = vset.pattern.permute.xlu1 %v529_v7 }
  0x49   :  { %133 = vperm.xlu1 %441, %v39_v2  }
  0x4a   :  { %445 = vset.pattern.permute.xlu0 %v536_v5 }
  0x4b   :  { %252 = vperm.xlu0 %445, %v584_v9  }
  0x4d   :  { %141 = vperm.xlu1 %441, %v41_v6  }
  0x51   :  { %145 = vperm.xlu1 %441, %v42_v4   ;;  %v535_v4 = vmov 0.0  }
  0x52   :  { %404 = vmatprep.mubr.msk.f32.mxu1 %vm534_vm1, %v535_v4 }
  0x55   :  { %166 = vrot.lane.b32.xlu1 %v40_v3, %s530_s1 }
  0x56   :  { %444 = vset.pattern.permute.xlu1 %v531_v8 }
  0x59   :  { %161 = vperm.xlu1 %444, %v40_v3   ;;  %v533_v3 = vmov 0.0|0.0  }
  0x5a   :  { %415 = vmatprep.subr.bf16.mxu1 %v533_v3 }
  0x5d   :  { %255 = vrot.lane.b32.xlu1 %v584_v9, %s532_s6 }
  0xa7   :  { %v78_v10 = vpop.permute.xlu1 %77  ;;  %v47_v11 = vpop.permute.xlu0 %46 }
  0xa8   :  { %v96_v33 = vmul.f32 %v95_v26, %v78_v10  ;;  %v68_v34 = vmul.f32 %v67_v27, %v47_v11 }
  0xaa   :  { %v100_v40 = vadd.f32 %v96_v33, %v68_v34 }
  0xab   :  { %v82_v12 = vpop.permute.xlu1 %81  ;;  %v52_v13 = vpop.permute.xlu0 %51 }
  0xac   :  { %v97_v31 = vmul.f32 %v95_v26, %v82_v12  ;;  %v69_v32 = vmul.f32 %v67_v27, %v52_v13 }
  0xae   :  { %v101_v37 = vadd.f32 %v97_v31, %v69_v32 }
  0xaf   :  { %v62_v14 = vpop.permute.xlu0 %61 }
  0xb0   :  { %v110_v15 = vpop.permute.xlu1 %109  ;;  %v71_v51 = vmul.f32 %v67_v27, %v62_v14 }
  0xb1   :  { %v125_v35 = vmul.f32 %v123_v28, %v110_v15 }
  0xb3   :  { %v129_v42 = vadd.f32 %v125_v35, %v101_v37 }
  0xb4   :  { %v106_v17 = vpop.permute.xlu0 %105 }
  0xb5   :  { %v57_v19 = vpop.permute.xlu1 %56  ;;  %v124_v38 = vmul.f32 %v123_v28, %v106_v17 }
  0xb6   :  { %v70_v43 = vmul.f32 %v67_v27, %v57_v19 }
  0xb7   :  { %v128_v45 = vadd.f32 %v124_v38, %v100_v40 }
  0xb8   :  { %v114_v20 = vpop.permute.xlu0 %113 }
  0xb9   :  { %v126_v47 = vmul.f32 %v123_v28, %v114_v20 }
  0xba   :  { %v86_v25 = vpop.permute.xlu1 %85 }
  0xbb   :  { %v98_v41 = vmul.f32 %v95_v26, %v86_v25 }
  0xbd   :  { %v138_v29 = vpop.permute.xlu0 %137  ;;  %v102_v48 = vadd.f32 %v98_v41, %v70_v43 }
  0xbe   :  { %v90_v30 = vpop.permute.xlu1 %89  ;;  %v149_v44 = vadd.f32 %v138_v29, %v129_v42 }
  0xbf   :  { %v99_v49 = vmul.f32 %v95_v26, %v90_v30  ;;  %v130_v57 = vadd.f32 %v126_v47, %v102_v48 }
  0xc0   :  { %v153_v52 = vmax.f32 %v149_v44, 0.0 }
  0xc1   :  { %v165_v36 = vpop.permute.xlu0 %164  ;;  %v103_v56 = vadd.f32 %v99_v49, %v71_v51 }
  0xc2   :  { %397 = vmatprep.mubr.msk.f32.mxu0 %vm168_vm0, %v165_v36 }
  0xc3   :  { %v118_v39 = vpop.permute.xlu1 %117 }
  0xc4   :  { %v127_v53 = vmul.f32 %v123_v28, %v118_v39 }
  0xc5   :  { %v158_v7 = vpop.permute.xlu0 %157 }
  0xc6   :  { %v131_v60 = vadd.f32 %v127_v53, %v103_v56 }
  0xc8   :  { %v134_v46 = vpop.permute.xlu1 %133 }
  0xc9   :  { %v148_v50 = vadd.f32 %v134_v46, %v128_v45 }
  0xca   :  { %v253_v17 = vpop.permute.xlu0 %252 }
  0xcb   :  { %v152_v54 = vmax.f32 %v148_v50, 0.0 }
  0xcc   :  { %v142_v55 = vpop.permute.xlu1 %141 }
  0xcd   :  { %v407_v58 = vpack.c.bf16 %v153_v52, %v152_v54  ;;  %v150_v59 = vadd.f32 %v142_v55, %v130_v57 }
  0xcf   :  { %408 = vmatprep.subr.bf16.mxu0 %v407_v58  ;;  %v154_v63 = vmax.f32 %v150_v59, 0.0 }
  0xd0   :  { %v146_v61 = vpop.permute.xlu1 %145  ;;  %410 = vmatpush3.bf16.msra.mxu0 %v407_v58 }
  0xd1   :  { %v151_v62 = vadd.f32 %v146_v61, %v131_v60 }
  0xd3   :  { %v155_v0 = vmax.f32 %v151_v62, 0.0 }
  0xd4   :  { %v167_v2 = vpop.permute.xlu1 %166 }
  0xd5   :  { %v411_v1 = vpack.c.bf16 %v155_v0, %v154_v63 }
  0xd7   :  { %412 = vmatprep.subr.bf16.mxu0 %v411_v1 }
  0xd8   :  { %414 = vmatpush3.bf16.msra.mxu0 %v411_v1  ;;  %v162_v6 = vpop.permute.xlu1 %161 }
  0xdb   :  { %398 = vmatmul.mubr.msk.f32.vlgmr.msra.gmra.mrb[0].mxu0 %vm168_vm0, %v167_v2 }
  0xdc   :  { %v256_v16 = vpop.permute.xlu1 %255 }
 0x1ae   :  { %v399_v8 = vpop.f32.mrb[0].mxu0 }
 0x1af   :  { %v245_v10 = vadd.f32 %v399_v8, %v162_v6  ;;  %v239_v11 = vpop.f32.mrb[1].mxu0 }
 0x1b0   :  { %v240_v12 = vadd.f32 %v239_v11, %v158_v7 }
 0x1b1   :  { %v249_v13 = vmax.f32 %v245_v10, 0.0 }
 0x1b2   :  { %v248_v14 = vmax.f32 %v240_v12, 0.0 }
 0x1b4   :  { %v416_v15 = vpack.c.bf16 %v249_v13, %v248_v14 }
 0x1b6   :  { %417 = vmatpush3.bf16.msra.mxu1 %v416_v15 }
 0x1b9   :  { %405 = vmatmul.mubr.msk.f32.vlgmr.msra.gmra.mrb[0].mxu1 %vm257_vm2, %v256_v16 }
 0x28c   :  { %v326_v18 = vpop.f32.mrb[0].mxu1 }
 0x28d   :  { %v327_v19 = vadd.f32 %v326_v18, %v253_v17  ;;  %v406_v20 = vpop.f32.mrb[1].mxu1 }
 0x28f   :  { %v331_v9 = vsel %vm330_vm3, %v327_v19, -inf }
 0x290   :  { %v332_v21 = vrot.slane %v331_v9, 4 }
 0x292   :  { %v333_v22 = vmax.f32 %v331_v9, %v332_v21 }
 0x294   :  { %v334_v23 = vrot.slane %v333_v22, 2 }
 0x296   :  { %v335_v25 = vmax.f32 %v333_v22, %v334_v23 }
 0x298   :  { %v336_v26 = vrot.slane %v335_v25, 1 }
 0x29a   :  { %v337_v27 = vmax.f32 %v335_v25, %v336_v26 }
 0x29c   :  { %v338_v28 = vsub.f32 %v327_v19, %v337_v27 }
 0x29e   :  { %v339_v29 = vmul.f32 1.442695, %v338_v28 }
 0x2a0   :  { %446 = vpow2.f32 %v339_v29 }
 0x2aa   :  { %v447_v30 = vpop.eup %446 }
 0x2ab   :  { %v341_v31 = vsel %vm330_vm3, %v447_v30, 0.0 }
 0x2ac   :  { %v342_v32 = vrot.slane %v341_v31, 4 }
 0x2ae   :  { %v343_v33 = vadd.f32 %v342_v32, %v341_v31 }
 0x2b0   :  { %v344_v34 = vrot.slane %v343_v33, 2 }
 0x2b2   :  { %v345_v35 = vadd.f32 %v344_v34, %v343_v33 }
 0x2b4   :  { %v346_v36 = vrot.slane %v345_v35, 1 }
 0x2b6   :  { %v347_v37 = vadd.f32 %v346_v36, %v345_v35 }
 0x2b8   :  { %448 = vrcp.f32 %v347_v37 }
 0x2c2   :  { %v449_v38 = vpop.eup %448 }
 0x2c3   :  { %v349_v39 = vmul.f32 %v449_v38, %v447_v30 }
 0x2c5   :  { %v350_v40 = vmul.f32 %v349_v39, %v587_v24  ;;  %358 = vst.msk [vmem:[#allocation7] sm:$0x7] %vm330_vm3, %v349_v39 }
 0x2c7   :  { %v351_v41 = vsel %vm330_vm3, %v350_v40, 0.0 }
 0x2c8   :  { %v352_v42 = vrot.slane %v351_v41, 4 }
 0x2ca   :  { %v353_v43 = vadd.f32 %v352_v42, %v351_v41 }
 0x2cc   :  { %v354_v44 = vrot.slane %v353_v43, 2 }
 0x2ce   :  { %v355_v45 = vadd.f32 %v354_v44, %v353_v43 }
 0x2d0   :  { %v356_v46 = vrot.slane %v355_v45, 1 }
 0x2d2   :  { %v357_v47 = vadd.f32 %v356_v46, %v355_v45 }
 0x2d4   :  { %360 = vst.msk [vmem:[#allocation7 + $0x3] sm:$0x1] %vm359_vm4, %v357_v47 }
 0x2d5   :  { %505 = shalt.err (!%p502_p6)
}
 0x2d6   :  { %s506_s12 = scalar_lea.hbm %s614_s2, 64 }
 0x2d7   :  { %p507_p7 = scmp.ne.s32.totalorder %s614_s2, %s506_s12  ;;  %p510_p8 = scmp.lt.u32.totalorder %s506_s12, %s614_s2 }
 0x2d9   :  { %p512_p9 = pnand %p510_p8, %p507_p7 }
 0x2db   :  { %515 = shalt.err (!%p512_p9)
}
 0x2dc   :  { %370 = dma.vmem_to_hbm [thread:$0]  %s368_s8, 64, %s614_s2, [#allocation4]  }
 0x2dd   :  { %520 = dma.done.wait [#allocation4], 64  }
 0x2de   :  { %521 = vsyncadd [#allocation4], 4294967232 }
 0x2df   :  { %374 = vsyncpa [#allocation3], 1 }
 0x2e0   :  { %375 = vsyncpa [#allocation6], 1 }
 0x2e1   :  { %376 = vsyncpa [#allocation4], 1 }

</bundles_post_ra>
